<compile_context>
chip_gen: v5e
topology: v5e:2x2
jax: 0.10.0
libtpu: 0.0.40
codegen_flags: <defaults>
</compile_context>

<pallas_src>
import functools

import jax
import jax.numpy as jnp
from jax import lax
from jax.experimental import pallas as pl
from jax.experimental.pallas import tpu as pltpu


def _round_up(x: int, m: int) -> int:
    return (x + m - 1) // m * m


def _ae_kernel(x_ref, w_ref, b_ref, a_ref, o_ref, *, inv_sigma):
    x = x_ref[...]                       # (TILE_N, dim_in)
    w = w_ref[...]                       # (dim_in, dim_out)

    # H = relu(Xs @ W + b)   — MXU matmul, f32 accumulation.
    h = lax.dot_general(
        x, w,
        dimension_numbers=(((1,), (0,)), ((), ())),
        preferred_element_type=jnp.float32,
    )
    h = jnp.maximum(h + b_ref[...], 0.0)

    # out = H @ W.T + a * (1/sigma) — contract on W's last dim directly,
    # no explicit transpose of W.
    out = lax.dot_general(
        h, w,
        dimension_numbers=(((1,), (1,)), ((), ())),
        preferred_element_type=jnp.float32,
    )
    out = out + a_ref[...] * inv_sigma
    o_ref[...] = out.astype(o_ref.dtype)


def model_ae_forward(xs, w, b, a, *, sigma=1.0, tile_n=256):
    n, dim_in = xs.shape
    dim_in_w, dim_out = w.shape
    assert dim_in == dim_in_w, "Xs and W dims disagree"

    inv_sigma = 1.0 / float(sigma)

    # ---- Pad feature dims to lane width (128) so stores are unmasked and
    # the MXU columns are fully used. Zero padding is semantically inert.
    dim_in_p = _round_up(dim_in, 128)
    dim_out_p = _round_up(dim_out, 128)
    if dim_in_p != dim_in or dim_out_p != dim_out:
        w = jnp.pad(w, ((0, dim_in_p - dim_in), (0, dim_out_p - dim_out)))
        b = jnp.pad(b, (0, dim_out_p - dim_out))
        a = jnp.pad(a, (0, dim_in_p - dim_in))
        xs = jnp.pad(xs, ((0, 0), (0, dim_in_p - dim_in)))

    # ---- Row tile: multiple of 8 (sublane), capped by (padded) N and by a
    # conservative VMEM budget (double-buffered Xs/out tiles + resident W).
    itemsize = 4
    vmem_cap = 24 << 20  # keep well under the 32 MiB default scoped VMEM
    resident = 2 * dim_in_p * dim_out_p * itemsize + 4 * (dim_in_p + dim_out_p) * itemsize
    per_row = (2 * 2 * dim_in_p + 2 * dim_out_p) * itemsize   # x/out dbl-buf + H
    max_rows = max(8, (vmem_cap - resident) // max(per_row, 1))
    tile_n = min(int(tile_n), _round_up(n, 8), int(max_rows))
    tile_n = max(8, _round_up(tile_n, 8))

    n_pad = _round_up(n, tile_n)
    if n_pad != n:
        xs = jnp.pad(xs, ((0, n_pad - n), (0, 0)))

    b2 = b.reshape(1, dim_out_p)
    a2 = a.reshape(1, dim_in_p)

    grid = (n_pad // tile_n,)

    vmem_bytes = (
        2 * 2 * tile_n * dim_in_p * itemsize      # Xs + out, double-buffered
        + 2 * dim_in_p * dim_out_p * itemsize     # W (resident, pipeline bufs)
        + 4 * (dim_in_p + dim_out_p) * itemsize   # a, b
        + 2 * tile_n * dim_out_p * itemsize       # H intermediate (headroom)
    )
    vmem_limit = int(min(max(2 * vmem_bytes, 8 << 20), 48 << 20))

    flops = 2 * 2 * n_pad * dim_in_p * dim_out_p  # two matmuls
    bytes_accessed = itemsize * (
        2 * n_pad * dim_in_p + dim_in_p * dim_out_p + dim_in_p + dim_out_p
    )
    cost = pl.CostEstimate(
        flops=flops, transcendentals=0, bytes_accessed=bytes_accessed
    )

    kernel = functools.partial(_ae_kernel, inv_sigma=inv_sigma)
    out = pl.pallas_call(
        kernel,
        out_shape=jax.ShapeDtypeStruct((n_pad, dim_in_p), xs.dtype),
        grid=grid,
        in_specs=[
            pl.BlockSpec((tile_n, dim_in_p), lambda i: (i, 0)),     # Xs tile
            pl.BlockSpec((dim_in_p, dim_out_p), lambda i: (0, 0)),  # W (resident)
            pl.BlockSpec((1, dim_out_p), lambda i: (0, 0)),         # b (resident)
            pl.BlockSpec((1, dim_in_p), lambda i: (0, 0)),          # a (resident)
        ],
        out_specs=pl.BlockSpec((tile_n, dim_in_p), lambda i: (i, 0)),
        compiler_params=pltpu.CompilerParams(
            dimension_semantics=("parallel",),
            vmem_limit_bytes=vmem_limit,
        ),
        cost_estimate=cost,
    )(xs, w, b2, a2)

    if n_pad != n or dim_in_p != dim_in:
        out = out[:n, :dim_in]
    return out


if __name__ == "__main__":
    key = jax.random.PRNGKey(0)
    k_x, k_w = jax.random.split(key)

    # Small but lane-dense shapes (dim_in / dim_out multiples of 128), with a
    # ragged N to exercise the row-tiled grid + padding path.
    n, dim_in, dim_out = 200, 128, 128
    sigma = 1.5

    # Deterministic parameter init (same scheme as the module's __init__).
    limit = jnp.sqrt(6.0 / (dim_in + dim_out))
    W = jax.random.uniform(k_w, (dim_in, dim_out), jnp.float32, -limit, limit)
    b = jnp.zeros((dim_out,), jnp.float32)
    a = jnp.zeros((dim_in,), jnp.float32)

    Xs = jax.random.normal(k_x, (n, dim_in), jnp.float32)

    out = model_ae_forward(Xs, W, b, a, sigma=sigma, tile_n=256)
    out = jax.block_until_ready(out)

    # Reference check in plain JAX (highest precision for the comparison).
    h_ref = jnp.maximum(
        jnp.dot(Xs, W, precision=lax.Precision.HIGHEST) + b, 0.0
    )
    ref = jnp.dot(h_ref, W.T, precision=lax.Precision.HIGHEST) + a / sigma

    assert out.shape == (n, dim_in)
    assert jnp.allclose(out, ref, atol=1e-3, rtol=1e-3), (
        float(jnp.max(jnp.abs(out - ref)))
    )

    print("KERNEL_OK")
</pallas_src>

<mosaic_0001>
module attributes {stable_mosaic.version = 11 : i64} {
  func.func @_ae_kernel(%arg0: i32, %arg1: memref<200x128xf32, #tpu.memory_space<vmem>>, %arg2: memref<128x128xf32, #tpu.memory_space<vmem>>, %arg3: memref<1x128xf32, #tpu.memory_space<vmem>>, %arg4: memref<1x128xf32, #tpu.memory_space<vmem>>, %arg5: memref<200x128xf32, #tpu.memory_space<vmem>>) attributes {dimension_semantics = [#tpu.dimension_semantics<parallel>], iteration_bounds = array<i64: 1>, scalar_prefetch = 0 : i64, scratch_operands = 0 : i64, tpu.core_type = #tpu.core_type<tc>, window_params = [{transform_indices = @transform_0, window_bounds = array<i64: 200, 128>}, {pipeline_mode = #tpu.pipeline_mode<synchronous>, transform_indices = @transform_1, window_bounds = array<i64: 128, 128>}, {pipeline_mode = #tpu.pipeline_mode<synchronous>, transform_indices = @transform_2, window_bounds = array<i64: 1, 128>}, {pipeline_mode = #tpu.pipeline_mode<synchronous>, transform_indices = @transform_3, window_bounds = array<i64: 1, 128>}, {transform_indices = @transform_4, window_bounds = array<i64: 200, 128>}]} {
    %c0 = arith.constant 0 : index
    %c0_0 = arith.constant 0 : index
    %0 = vector.load %arg1[%c0, %c0_0] : memref<200x128xf32, #tpu.memory_space<vmem>>, vector<200x128xf32>
    %c0_1 = arith.constant 0 : index
    %c0_2 = arith.constant 0 : index
    %1 = vector.load %arg2[%c0_1, %c0_2] : memref<128x128xf32, #tpu.memory_space<vmem>>, vector<128x128xf32>
    %cst = arith.constant dense<0.000000e+00> : vector<200x128xf32>
    %2 = tpu.matmul %0, %1, %cst {dimension_numbers = #tpu.dot_dimension_numbers<[1], [0], [0], [1], [0, 0, 1, 1], [], []>} : vector<200x128xf32>, vector<128x128xf32>, vector<200x128xf32> -> vector<200x128xf32>
    %c0_3 = arith.constant 0 : index
    %c0_4 = arith.constant 0 : index
    %3 = vector.load %arg3[%c0_3, %c0_4] : memref<1x128xf32, #tpu.memory_space<vmem>>, vector<1x128xf32>
    %4 = vector.broadcast %3 : vector<1x128xf32> to vector<200x128xf32>
    %5 = arith.addf %2, %4 : vector<200x128xf32>
    %cst_5 = arith.constant 0.000000e+00 : f32
    %6 = vector.broadcast %cst_5 : f32 to vector<200x128xf32>
    %7 = arith.maximumf %5, %6 : vector<200x128xf32>
    %cst_6 = arith.constant dense<0.000000e+00> : vector<200x128xf32>
    %8 = tpu.matmul %7, %1, %cst_6 {dimension_numbers = #tpu.dot_dimension_numbers<[1], [1], [0], [0], [0, 0, 1, 0], [], []>} : vector<200x128xf32>, vector<128x128xf32>, vector<200x128xf32> -> vector<200x128xf32>
    %c0_7 = arith.constant 0 : index
    %c0_8 = arith.constant 0 : index
    %9 = vector.load %arg4[%c0_7, %c0_8] : memref<1x128xf32, #tpu.memory_space<vmem>>, vector<1x128xf32>
    %cst_9 = arith.constant 0.666666686 : f32
    %10 = vector.broadcast %cst_9 : f32 to vector<1x128xf32>
    %11 = arith.mulf %9, %10 : vector<1x128xf32>
    %12 = vector.broadcast %11 : vector<1x128xf32> to vector<200x128xf32>
    %13 = arith.addf %8, %12 : vector<200x128xf32>
    %c0_10 = arith.constant 0 : index
    %c0_11 = arith.constant 0 : index
    %14 = vector.load %arg5[%c0_10, %c0_11] : memref<200x128xf32, #tpu.memory_space<vmem>>, vector<200x128xf32>
    tpu.vector_store %arg5[%c0_10, %c0_11], %13 {strides = array<i32>} : memref<200x128xf32, #tpu.memory_space<vmem>>, vector<200x128xf32>,
    return
  }
  func.func @transform_0(%arg0: i32) -> (i32, i32) {
    %c0_i32 = arith.constant 0 : i32
    %c0_i32_0 = arith.constant 0 : i32
    return %arg0, %c0_i32 : i32, i32
  }
  func.func @transform_1(%arg0: i32) -> (i32, i32) {
    %c0_i32 = arith.constant 0 : i32
    %c0_i32_0 = arith.constant 0 : i32
    %c0_i32_1 = arith.constant 0 : i32
    return %c0_i32, %c0_i32_0 : i32, i32
  }
  func.func @transform_2(%arg0: i32) -> (i32, i32) {
    %c0_i32 = arith.constant 0 : i32
    %c0_i32_0 = arith.constant 0 : i32
    %c0_i32_1 = arith.constant 0 : i32
    return %c0_i32, %c0_i32_0 : i32, i32
  }
  func.func @transform_3(%arg0: i32) -> (i32, i32) {
    %c0_i32 = arith.constant 0 : i32
    %c0_i32_0 = arith.constant 0 : i32
    %c0_i32_1 = arith.constant 0 : i32
    return %c0_i32, %c0_i32_0 : i32, i32
  }
  func.func @transform_4(%arg0: i32) -> (i32, i32) {
    %c0_i32 = arith.constant 0 : i32
    %c0_i32_0 = arith.constant 0 : i32
    return %arg0, %c0_i32 : i32, i32
  }
}

</mosaic_0001>

<bundles_post_ra>
// kernel: tpu_custom_call.1
= control target key start
LH: loop header
LB: loop body
LE: loop exit
PB: predicated region body
PF: predicated region fallthrough
CT: control target
= control target key end

     0   :  { %9 = vsyncpa [#allocation3], 0  ;;  %s671_s0 = inlined_call_operand.hbm [shape: f32[200,128], index: 0, kind: input, shape index: {}]   ;;  %s672_s1 = inlined_call_operand.hbm [shape: f32[128,128], index: 1, kind: input, shape index: {}]   ;;  %s673_s2 = inlined_call_operand.vmem [shape: f32[1,128], index: 2, kind: input, shape index: {}]   ;;  %s674_s3 = inlined_call_operand.vmem [shape: f32[1,128], index: 3, kind: input, shape index: {}]   ;;  %s675_s4 = inlined_call_operand.hbm [shape: f32[200,128], index: 4, kind: output, shape index: {}]  }
   0x1   :  { %10 = vsyncpa [#allocation6], 0 }
   0x2   :  { %11 = vsyncpa [#allocation4], 0  ;;  %s16_s17 = sshll.u32 %s671_s0, 4  ;;  %s486_s18 = smov [#allocation2]   ;;  %s17_s17 = int_to_ptr.hbm [resolvable:$true] %s16_s17 }
   0x3   :  { %s18_s19 = sshll.u32 %s486_s18, 4  ;;  %s29_s22 = sshll.u32 %s672_s1, 4  ;;  %s19_s19 = int_to_ptr.vmem [resolvable:$true] %s18_s19  ;;  %s30_s22 = int_to_ptr.hbm [resolvable:$true] %s29_s22 }
   0x4   :  { %s487_s23 = smov 128   ;;  %s488_s24 = smov 8  }
   0x5   :  { %24 = dma.hbm_to_vmem [thread:$0]  %s17_s17, 3200, %s19_s19, [#allocation3], %s487_s23, %s487_s23, %s488_s24  }
   0x6   :  { %s489_s25 = smov [#allocation5]  }
   0x7   :  { %s31_s26 = sshll.u32 %s489_s25, 4  ;;  %s32_s26 = int_to_ptr.vmem [resolvable:$true] %s31_s26 }
   0x8   :  { %37 = dma.hbm_to_vmem [thread:$0]  %s30_s22, 2048, %s32_s26, [#allocation6], %s487_s23, %s487_s23, %s488_s24  }
   0x9   :  { %480 = dma.done.wait [#allocation3], 3200  }
   0xa   :  { %481 = vsyncadd [#allocation3], 4294964096 }
   0xb   :  { %482 = dma.done.wait [#allocation6], 2048  }
   0xc   :  { %483 = vsyncadd [#allocation6], 4294965248  ;;  %v528_v0 = vld [vmem:[#allocation5 + $0x78] sm:$0xff]  ;;  %v530_v1 = vld [vmem:[#allocation5 + $0x70] sm:$0xff]  ;;  %s340_s5 = sshll.u32 %s675_s4, 4  ;;  %s341_s5 = int_to_ptr.hbm [resolvable:$true] %s340_s5 }
   0xd   :  { %95 = vmatpush.msra.mxu0 %v528_v0  ;;  %354 = vmatpush.msra.mxu3 %v528_v0  ;;  %v534_v2 = vld [vmem:[#allocation5 + $0x68] sm:$0xff]  ;;  %v540_v3 = vld [vmem:[#allocation5 + $0x60] sm:$0xff]  ;;  %v544_v4 = vld [vmem:[#allocation5 + $0x58] sm:$0xff] }
   0xe   :  { %217 = vmatpush.xpose.msra.mxu1 %v528_v0  ;;  %370 = vmatpush.xpose.msra.mxu2 %v528_v0  ;;  %v550_v5 = vld [vmem:[#allocation5 + $0x50] sm:$0xff]  ;;  %v554_v6 = vld [vmem:[#allocation5 + $0x48] sm:$0xff]  ;;  %v560_v7 = vld [vmem:[#allocation5 + $0x40] sm:$0xff] }
   0xf   :  { %96 = vmatpush.msra.mxu0 %v530_v1  ;;  %355 = vmatpush.msra.mxu3 %v530_v1  ;;  %v564_v8 = vld [vmem:[#allocation5 + $0x38] sm:$0xff]  ;;  %v570_v9 = vld [vmem:[#allocation5 + $0x30] sm:$0xff]  ;;  %v574_v10 = vld [vmem:[#allocation5 + $0x28] sm:$0xff] }
  0x10   :  { %v79_v11 = vld [vmem:[#allocation5 + $0x20] sm:$0xff]  ;;  %v78_v12 = vld [vmem:[#allocation5 + $0x18] sm:$0xff]  ;;  %v77_v13 = vld [vmem:[#allocation5 + $0x10] sm:$0xff] }
  0x11   :  { %97 = vmatpush.msra.mxu0 %v534_v2  ;;  %356 = vmatpush.msra.mxu3 %v534_v2  ;;  %v76_v14 = vld [vmem:[#allocation5 + $0x8] sm:$0xff]  ;;  %v75_v15 = vld [vmem:[#allocation5] sm:$0xff]  ;;  %v50_v16 = vld [vmem:[#allocation2] sm:$0xff] }
  0x12   :  { %218 = vmatpush.xpose.msra.mxu1 %v530_v1  ;;  %372 = vmatpush.xpose.msra.mxu2 %v530_v1  ;;  %v51_v17 = vld [vmem:[#allocation2 + $0x8] sm:$0xff]  ;;  %v52_v18 = vld [vmem:[#allocation2 + $0x10] sm:$0xff]  ;;  %v53_v19 = vld [vmem:[#allocation2 + $0x18] sm:$0xff] }
  0x13   :  { %98 = vmatpush.msra.mxu0 %v540_v3  ;;  %357 = vmatpush.msra.mxu3 %v540_v3  ;;  %v54_v20 = vld [vmem:[#allocation2 + $0x20] sm:$0xff]  ;;  %v55_v21 = vld [vmem:[#allocation2 + $0x28] sm:$0xff]  ;;  %v56_v22 = vld [vmem:[#allocation2 + $0x30] sm:$0xff] }
  0x14   :  { %v65_v23 = vld [vmem:[#allocation2 + $0x78] sm:$0xff]  ;;  %v66_v25 = vld [vmem:[#allocation2 + $0x80] sm:$0xff]  ;;  %v67_v27 = vld [vmem:[#allocation2 + $0x88] sm:$0xff] }
  0x15   :  { %99 = vmatpush.msra.mxu0 %v544_v4  ;;  %358 = vmatpush.msra.mxu3 %v544_v4  ;;  %v57_v24 = vld [vmem:[#allocation2 + $0x38] sm:$0xff]  ;;  %v58_v26 = vld [vmem:[#allocation2 + $0x40] sm:$0xff]  ;;  %v59_v28 = vld [vmem:[#allocation2 + $0x48] sm:$0xff] }
  0x16   :  { %219 = vmatpush.xpose.msra.mxu1 %v534_v2  ;;  %374 = vmatpush.xpose.msra.mxu2 %v534_v2  ;;  %v68_v29 = vld [vmem:[#allocation2 + $0x90] sm:$0xff]  ;;  %v69_v31 = vld [vmem:[#allocation2 + $0x98] sm:$0xff]  ;;  %v70_v33 = vld [vmem:[#allocation2 + $0xa0] sm:$0xff] }
  0x17   :  { %100 = vmatpush.msra.mxu0 %v550_v5  ;;  %359 = vmatpush.msra.mxu3 %v550_v5  ;;  %v60_v30 = vld [vmem:[#allocation2 + $0x50] sm:$0xff]  ;;  %v61_v32 = vld [vmem:[#allocation2 + $0x58] sm:$0xff]  ;;  %v62_v34 = vld [vmem:[#allocation2 + $0x60] sm:$0xff] }
  0x18   :  { %v71_v35 = vld [vmem:[#allocation2 + $0xa8] sm:$0xff]  ;;  %v72_v37 = vld [vmem:[#allocation2 + $0xb0] sm:$0xff]  ;;  %v73_v39 = vld [vmem:[#allocation2 + $0xb8] sm:$0xff] }
  0x19   :  { %101 = vmatpush.msra.mxu0 %v554_v6  ;;  %360 = vmatpush.msra.mxu3 %v554_v6  ;;  %v63_v36 = vld [vmem:[#allocation2 + $0x68] sm:$0xff]  ;;  %v64_v38 = vld [vmem:[#allocation2 + $0x70] sm:$0xff]  ;;  %v74_v40 = vld [vmem:[#allocation2 + $0xc0] sm:$0xff] }
  0x1a   :  { %220 = vmatpush.xpose.msra.mxu1 %v540_v3  ;;  %376 = vmatpush.xpose.msra.mxu2 %v540_v3  ;;  %v608_v41 = vld [vmem:[%s673_s2] ss:$0 sm:$0xff] }
  0x1b   :  { %102 = vmatpush.msra.mxu0 %v560_v7  ;;  %361 = vmatpush.msra.mxu3 %v560_v7 }
  0x1d   :  { %103 = vmatpush.msra.mxu0 %v564_v8  ;;  %362 = vmatpush.msra.mxu3 %v564_v8 }
  0x1e   :  { %221 = vmatpush.xpose.msra.mxu1 %v544_v4  ;;  %378 = vmatpush.xpose.msra.mxu2 %v544_v4 }
  0x1f   :  { %104 = vmatpush.msra.mxu0 %v570_v9  ;;  %363 = vmatpush.msra.mxu3 %v570_v9 }
  0x21   :  { %105 = vmatpush.msra.mxu0 %v574_v10  ;;  %364 = vmatpush.msra.mxu3 %v574_v10 }
  0x22   :  { %222 = vmatpush.xpose.msra.mxu1 %v550_v5  ;;  %380 = vmatpush.xpose.msra.mxu2 %v550_v5 }
  0x23   :  { %106 = vmatpush.msra.mxu0 %v79_v11  ;;  %365 = vmatpush.msra.mxu3 %v79_v11 }
  0x25   :  { %107 = vmatpush.msra.mxu0 %v78_v12  ;;  %366 = vmatpush.msra.mxu3 %v78_v12 }
  0x26   :  { %223 = vmatpush.xpose.msra.mxu1 %v554_v6  ;;  %382 = vmatpush.xpose.msra.mxu2 %v554_v6 }
  0x27   :  { %108 = vmatpush.msra.mxu0 %v77_v13  ;;  %367 = vmatpush.msra.mxu3 %v77_v13 }
  0x29   :  { %109 = vmatpush.msra.mxu0 %v76_v14  ;;  %368 = vmatpush.msra.mxu3 %v76_v14 }
  0x2a   :  { %224 = vmatpush.xpose.msra.mxu1 %v560_v7  ;;  %384 = vmatpush.xpose.msra.mxu2 %v560_v7 }
  0x2b   :  { %110 = vmatpush.msra.mxu0 %v75_v15  ;;  %369 = vmatpush.msra.mxu3 %v75_v15 }
  0x2c   :  { %111 = vmatmul.f32.vlgmr.msra.gmra.mxu0 %v50_v16  ;;  %156 = vmatmul.f32.vlgmr.msra.gmra.mxu3 %v65_v23 }
  0x2d   :  { %371 = vmatpush.xpose.msrb.mxu3 %v528_v0 }
  0x2e   :  { %225 = vmatpush.xpose.msra.mxu1 %v564_v8  ;;  %386 = vmatpush.xpose.msra.mxu2 %v564_v8 }
  0x31   :  { %373 = vmatpush.xpose.msrb.mxu3 %v530_v1 }
  0x32   :  { %226 = vmatpush.xpose.msra.mxu1 %v570_v9  ;;  %388 = vmatpush.xpose.msra.mxu2 %v570_v9 }
  0x34   :  { %114 = vmatmul.f32.gmra.mxu0 %v51_v17  ;;  %159 = vmatmul.f32.gmra.mxu3 %v66_v25 }
  0x35   :  { %375 = vmatpush.xpose.msrb.mxu3 %v534_v2 }
  0x36   :  { %227 = vmatpush.xpose.msra.mxu1 %v574_v10  ;;  %390 = vmatpush.xpose.msra.mxu2 %v574_v10 }
  0x39   :  { %377 = vmatpush.xpose.msrb.mxu3 %v540_v3 }
  0x3a   :  { %228 = vmatpush.xpose.msra.mxu1 %v79_v11  ;;  %392 = vmatpush.xpose.msra.mxu2 %v79_v11 }
  0x3c   :  { %117 = vmatmul.f32.gmra.mxu0 %v52_v18  ;;  %162 = vmatmul.f32.gmra.mxu3 %v67_v27 }
  0x3d   :  { %379 = vmatpush.xpose.msrb.mxu3 %v544_v4 }
  0x3e   :  { %229 = vmatpush.xpose.msra.mxu1 %v78_v12  ;;  %394 = vmatpush.xpose.msra.mxu2 %v78_v12 }
  0x41   :  { %381 = vmatpush.xpose.msrb.mxu3 %v550_v5 }
  0x42   :  { %230 = vmatpush.xpose.msra.mxu1 %v77_v13  ;;  %396 = vmatpush.xpose.msra.mxu2 %v77_v13 }
  0x44   :  { %120 = vmatmul.f32.gmra.mxu0 %v53_v19  ;;  %165 = vmatmul.f32.gmra.mxu3 %v68_v29 }
  0x45   :  { %383 = vmatpush.xpose.msrb.mxu3 %v554_v6 }
  0x46   :  { %231 = vmatpush.xpose.msra.mxu1 %v76_v14  ;;  %398 = vmatpush.xpose.msra.mxu2 %v76_v14 }
  0x49   :  { %385 = vmatpush.xpose.msrb.mxu3 %v560_v7 }
  0x4a   :  { %232 = vmatpush.xpose.msra.mxu1 %v75_v15  ;;  %400 = vmatpush.xpose.msra.mxu2 %v75_v15 }
  0x4c   :  { %123 = vmatmul.f32.gmra.mxu0 %v54_v20  ;;  %168 = vmatmul.f32.gmra.mxu3 %v69_v31 }
  0x4d   :  { %387 = vmatpush.xpose.msrb.mxu3 %v564_v8 }
  0x51   :  { %389 = vmatpush.xpose.msrb.mxu3 %v570_v9 }
  0x54   :  { %126 = vmatmul.f32.gmra.mxu0 %v55_v21  ;;  %171 = vmatmul.f32.gmra.mxu3 %v70_v33 }
  0x55   :  { %391 = vmatpush.xpose.msrb.mxu3 %v574_v10 }
  0x59   :  { %393 = vmatpush.xpose.msrb.mxu3 %v79_v11 }
  0x5c   :  { %129 = vmatmul.f32.gmra.mxu0 %v56_v22  ;;  %174 = vmatmul.f32.gmra.mxu3 %v71_v35 }
  0x5d   :  { %395 = vmatpush.xpose.msrb.mxu3 %v78_v12 }
  0x61   :  { %397 = vmatpush.xpose.msrb.mxu3 %v77_v13 }
  0x64   :  { %132 = vmatmul.f32.gmra.mxu0 %v57_v24  ;;  %177 = vmatmul.f32.gmra.mxu3 %v72_v37 }
  0x65   :  { %399 = vmatpush.xpose.msrb.mxu3 %v76_v14 }
  0x69   :  { %401 = vmatpush.xpose.msrb.mxu3 %v75_v15 }
  0x6c   :  { %135 = vmatmul.f32.gmra.mxu0 %v58_v26  ;;  %180 = vmatmul.f32.gmra.mxu3 %v73_v39 }
  0x74   :  { %138 = vmatmul.f32.gmra.mxu0 %v59_v28  ;;  %183 = vmatmul.f32.gmra.mxu3 %v74_v40 }
  0x7c   :  { %141 = vmatmul.f32.gmra.mxu0 %v60_v30 }
  0x84   :  { %144 = vmatmul.f32.gmra.mxu0 %v61_v32 }
  0x8c   :  { %147 = vmatmul.f32.gmra.mxu0 %v62_v34 }
  0x94   :  { %150 = vmatmul.f32.gmra.mxu0 %v63_v36  ;;  %v212_v36 = vld [vmem:[%s674_s3] sm:$0x1]  ;;  %s490_s3 = smov [#allocation7]  }
  0x95   :  { %v213_v40 = vmul.f32 0.6666667, %v212_v36  ;;  %s338_s28 = sshll.u32 %s490_s3, 4  ;;  %s339_s28 = int_to_ptr.vmem [resolvable:$true] %s338_s28 }
  0x9c   :  { %153 = vmatmul.f32.gmra.mxu0 %v64_v38 }
  0xa9   :  { %v112_v42 = vpop.f32.mrf.mxu0 }
  0xaa   :  { %v113_v43 = vadd.f32 %v608_v41, %v112_v42 }
  0xac   :  { %v187_v44 = vmax.f32 %v113_v43, 0.0 }
  0xae   :  { %233 = vmatmul.f32.vlgmr.msra.gmra.mxu1 %v187_v44  ;;  %v633_v44 = vperm.slane %v213_v40, 0 }
  0xaf   :  { %v157_v0 = vpop.f32.mrf.mxu3 }
  0xb0   :  { %v158_v35 = vadd.f32 %v608_v41, %v157_v0 }
  0xb1   :  { %v115_v45 = vpop.f32.mrf.mxu0 }
  0xb2   :  { %v116_v46 = vadd.f32 %v608_v41, %v115_v45  ;;  %v202_v39 = vmax.f32 %v158_v35, 0.0 }
  0xb4   :  { %v188_v47 = vmax.f32 %v116_v46, 0.0 }
  0xb6   :  { %236 = vmatmul.f32.gmra.mxu1 %v188_v47 }
  0xb7   :  { %v160_v4 = vpop.f32.mrf.mxu3 }
  0xb8   :  { %v161_v43 = vadd.f32 %v608_v41, %v160_v4 }
  0xb9   :  { %v118_v48 = vpop.f32.mrf.mxu0 }
  0xba   :  { %v119_v49 = vadd.f32 %v608_v41, %v118_v48  ;;  %v203_v48 = vmax.f32 %v161_v43, 0.0 }
  0xbc   :  { %v189_v50 = vmax.f32 %v119_v49, 0.0 }
  0xbe   :  { %239 = vmatmul.f32.gmra.mxu1 %v189_v50 }
  0xbf   :  { %v163_v8 = vpop.f32.mrf.mxu3 }
  0xc1   :  { %v121_v51 = vpop.f32.mrf.mxu0 }
  0xc2   :  { %v122_v52 = vadd.f32 %v608_v41, %v121_v51  ;;  %v164_v51 = vadd.f32 %v608_v41, %v163_v8 }
  0xc4   :  { %v190_v53 = vmax.f32 %v122_v52, 0.0 }
  0xc6   :  { %242 = vmatmul.f32.gmra.mxu1 %v190_v53  ;;  %v204_v53 = vmax.f32 %v164_v51, 0.0 }
  0xc7   :  { %v166_v12 = vpop.f32.mrf.mxu3 }
  0xc9   :  { %v124_v54 = vpop.f32.mrf.mxu0 }
  0xca   :  { %v125_v55 = vadd.f32 %v608_v41, %v124_v54 }
  0xcc   :  { %v191_v56 = vmax.f32 %v125_v55, 0.0  ;;  %v167_v55 = vadd.f32 %v608_v41, %v166_v12 }
  0xce   :  { %245 = vmatmul.f32.gmra.mxu1 %v191_v56 }
  0xcf   :  { %v169_v16 = vpop.f32.mrf.mxu3 }
  0xd1   :  { %v127_v57 = vpop.f32.mrf.mxu0 }
  0xd2   :  { %v128_v58 = vadd.f32 %v608_v41, %v127_v57  ;;  %v205_v57 = vmax.f32 %v167_v55, 0.0 }
  0xd4   :  { %v192_v59 = vmax.f32 %v128_v58, 0.0 }
  0xd6   :  { %248 = vmatmul.f32.gmra.mxu1 %v192_v59  ;;  %v170_v59 = vadd.f32 %v608_v41, %v169_v16 }
  0xd7   :  { %v172_v20 = vpop.f32.mrf.mxu3 }
  0xd9   :  { %v130_v60 = vpop.f32.mrf.mxu0 }
  0xda   :  { %v131_v61 = vadd.f32 %v608_v41, %v130_v60 }
  0xdc   :  { %v193_v62 = vmax.f32 %v131_v61, 0.0  ;;  %v206_v61 = vmax.f32 %v170_v59, 0.0 }
  0xde   :  { %251 = vmatmul.f32.gmra.mxu1 %v193_v62 }
  0xdf   :  { %v175_v24 = vpop.f32.mrf.mxu3 }
  0xe0   :  { %v176_v26 = vadd.f32 %v608_v41, %v175_v24 }
  0xe1   :  { %v133_v63 = vpop.f32.mrf.mxu0 }
  0xe2   :  { %v134_v1 = vadd.f32 %v608_v41, %v133_v63  ;;  %v208_v28 = vmax.f32 %v176_v26, 0.0  ;;  %v173_v63 = vadd.f32 %v608_v41, %v172_v20 }
  0xe4   :  { %v194_v2 = vmax.f32 %v134_v1, 0.0  ;;  %296 = vmatmul.f32.vlgmr.msrb.gmra.mxu3 %v208_v28  ;;  %v207_v1 = vmax.f32 %v173_v63, 0.0 }
  0xe6   :  { %254 = vmatmul.f32.gmra.mxu1 %v194_v2 }
  0xe7   :  { %v178_v30 = vpop.f32.mrf.mxu3 }
  0xe8   :  { %v179_v32 = vadd.f32 %v608_v41, %v178_v30 }
  0xe9   :  { %v136_v3 = vpop.f32.mrf.mxu0 }
  0xea   :  { %v137_v5 = vadd.f32 %v608_v41, %v136_v3  ;;  %v209_v34 = vmax.f32 %v179_v32, 0.0 }
  0xec   :  { %v195_v6 = vmax.f32 %v137_v5, 0.0  ;;  %299 = vmatmul.f32.gmra.mxu3 %v209_v34 }
  0xee   :  { %257 = vmatmul.f32.gmra.mxu1 %v195_v6 }
  0xef   :  { %v181_v37 = vpop.f32.mrf.mxu3 }
  0xf0   :  { %v182_v38 = vadd.f32 %v608_v41, %v181_v37 }
  0xf1   :  { %v139_v7 = vpop.f32.mrf.mxu0 }
  0xf2   :  { %v140_v9 = vadd.f32 %v608_v41, %v139_v7  ;;  %v210_v42 = vmax.f32 %v182_v38, 0.0 }
  0xf4   :  { %v196_v10 = vmax.f32 %v140_v9, 0.0  ;;  %302 = vmatmul.f32.gmra.mxu3 %v210_v42 }
  0xf6   :  { %260 = vmatmul.f32.gmra.mxu1 %v196_v10 }
  0xf7   :  { %v184_v45 = vpop.f32.mrf.mxu3 }
  0xf8   :  { %v185_v46 = vadd.f32 %v608_v41, %v184_v45 }
  0xf9   :  { %v142_v11 = vpop.f32.mrf.mxu0 }
  0xfa   :  { %v143_v13 = vadd.f32 %v608_v41, %v142_v11  ;;  %v211_v50 = vmax.f32 %v185_v46, 0.0 }
  0xfc   :  { %v197_v14 = vmax.f32 %v143_v13, 0.0  ;;  %305 = vmatmul.f32.gmra.mxu3 %v211_v50 }
  0xfe   :  { %263 = vmatmul.f32.vlgmr.msra.gmra.mxu2 %v197_v14 }
 0x101   :  { %v145_v15 = vpop.f32.mrf.mxu0 }
 0x102   :  { %v146_v17 = vadd.f32 %v608_v41, %v145_v15 }
 0x104   :  { %v198_v18 = vmax.f32 %v146_v17, 0.0 }
 0x106   :  { %266 = vmatmul.f32.gmra.mxu2 %v198_v18 }
 0x109   :  { %v148_v19 = vpop.f32.mrf.mxu0 }
 0x10a   :  { %v149_v21 = vadd.f32 %v608_v41, %v148_v19 }
 0x10c   :  { %v199_v22 = vmax.f32 %v149_v21, 0.0 }
 0x10e   :  { %269 = vmatmul.f32.gmra.mxu2 %v199_v22 }
 0x111   :  { %v151_v23 = vpop.f32.mrf.mxu0 }
 0x112   :  { %v152_v25 = vadd.f32 %v608_v41, %v151_v23 }
 0x114   :  { %v200_v27 = vmax.f32 %v152_v25, 0.0 }
 0x116   :  { %272 = vmatmul.f32.gmra.mxu2 %v200_v27 }
 0x119   :  { %v154_v29 = vpop.f32.mrf.mxu0 }
 0x11a   :  { %v155_v31 = vadd.f32 %v608_v41, %v154_v29 }
 0x11c   :  { %v201_v33 = vmax.f32 %v155_v31, 0.0 }
 0x11e   :  { %275 = vmatmul.f32.gmra.mxu2 %v201_v33 }
 0x126   :  { %278 = vmatmul.f32.gmra.mxu2 %v202_v39 }
 0x12b   :  { %v234_v47 = vpop.f32.mrf.mxu1 }
 0x12c   :  { %v235_v49 = vadd.f32 %v234_v47, %v633_v44 }
 0x12e   :  { %309 = vst [vmem:[#allocation7] sm:$0xff] %v235_v49  ;;  %281 = vmatmul.f32.gmra.mxu2 %v203_v48 }
 0x133   :  { %v237_v52 = vpop.f32.mrf.mxu1 }
 0x134   :  { %v238_v54 = vadd.f32 %v237_v52, %v633_v44 }
 0x136   :  { %310 = vst [vmem:[#allocation7 + $0x8] sm:$0xff] %v238_v54  ;;  %284 = vmatmul.f32.gmra.mxu2 %v204_v53 }
 0x13b   :  { %v240_v56 = vpop.f32.mrf.mxu1 }
 0x13c   :  { %v241_v58 = vadd.f32 %v240_v56, %v633_v44 }
 0x13e   :  { %311 = vst [vmem:[#allocation7 + $0x10] sm:$0xff] %v241_v58  ;;  %287 = vmatmul.f32.gmra.mxu2 %v205_v57 }
 0x143   :  { %v243_v60 = vpop.f32.mrf.mxu1 }
 0x144   :  { %v244_v62 = vadd.f32 %v243_v60, %v633_v44 }
 0x146   :  { %312 = vst [vmem:[#allocation7 + $0x18] sm:$0xff] %v244_v62  ;;  %290 = vmatmul.f32.gmra.mxu2 %v206_v61 }
 0x14b   :  { %v246_v0 = vpop.f32.mrf.mxu1 }
 0x14c   :  { %v247_v2 = vadd.f32 %v246_v0, %v633_v44 }
 0x14e   :  { %313 = vst [vmem:[#allocation7 + $0x20] sm:$0xff] %v247_v2  ;;  %293 = vmatmul.f32.gmra.mxu2 %v207_v1 }
 0x153   :  { %v249_v3 = vpop.f32.mrf.mxu1 }
 0x154   :  { %v250_v4 = vadd.f32 %v249_v3, %v633_v44 }
 0x156   :  { %314 = vst [vmem:[#allocation7 + $0x28] sm:$0xff] %v250_v4 }
 0x15b   :  { %v252_v5 = vpop.f32.mrf.mxu1 }
 0x15c   :  { %v253_v6 = vadd.f32 %v252_v5, %v633_v44 }
 0x15e   :  { %315 = vst [vmem:[#allocation7 + $0x30] sm:$0xff] %v253_v6 }
 0x163   :  { %v255_v7 = vpop.f32.mrf.mxu1 }
 0x164   :  { %v256_v8 = vadd.f32 %v255_v7, %v633_v44 }
 0x166   :  { %316 = vst [vmem:[#allocation7 + $0x38] sm:$0xff] %v256_v8 }
 0x167   :  { %v297_v19 = vpop.f32.mrf.mxu3 }
 0x168   :  { %v298_v21 = vadd.f32 %v297_v19, %v633_v44 }
 0x16a   :  { %330 = vst [vmem:[#allocation7 + $0xa8] sm:$0xff] %v298_v21 }
 0x16b   :  { %v258_v9 = vpop.f32.mrf.mxu1 }
 0x16c   :  { %v259_v41 = vadd.f32 %v258_v9, %v633_v44 }
 0x16e   :  { %317 = vst [vmem:[#allocation7 + $0x40] sm:$0xff] %v259_v41 }
 0x16f   :  { %v300_v23 = vpop.f32.mrf.mxu3 }
 0x170   :  { %v301_v25 = vadd.f32 %v300_v23, %v633_v44 }
 0x172   :  { %331 = vst [vmem:[#allocation7 + $0xb0] sm:$0xff] %v301_v25 }
 0x173   :  { %v261_v10 = vpop.f32.mrf.mxu1 }
 0x174   :  { %v262_v11 = vadd.f32 %v261_v10, %v633_v44 }
 0x176   :  { %318 = vst [vmem:[#allocation7 + $0x48] sm:$0xff] %v262_v11 }
 0x177   :  { %v303_v27 = vpop.f32.mrf.mxu3 }
 0x178   :  { %v304_v29 = vadd.f32 %v303_v27, %v633_v44 }
 0x17a   :  { %332 = vst [vmem:[#allocation7 + $0xb8] sm:$0xff] %v304_v29 }
 0x17f   :  { %v306_v31 = vpop.f32.mrf.mxu3 }
 0x180   :  { %v307_v33 = vadd.f32 %v306_v31, %v633_v44 }
 0x181   :  { %v264_v12 = vpop.f32.mrf.mxu2 }
 0x182   :  { %v265_v13 = vadd.f32 %v264_v12, %v633_v44  ;;  %333 = vst [vmem:[#allocation7 + $0xc0] sm:$0xff] %v307_v33 }
 0x184   :  { %319 = vst [vmem:[#allocation7 + $0x50] sm:$0xff] %v265_v13 }
 0x189   :  { %v267_v14 = vpop.f32.mrf.mxu2 }
 0x18a   :  { %v268_v15 = vadd.f32 %v267_v14, %v633_v44 }
 0x18c   :  { %320 = vst [vmem:[#allocation7 + $0x58] sm:$0xff] %v268_v15 }
 0x191   :  { %v270_v16 = vpop.f32.mrf.mxu2 }
 0x192   :  { %v271_v17 = vadd.f32 %v270_v16, %v633_v44 }
 0x194   :  { %321 = vst [vmem:[#allocation7 + $0x60] sm:$0xff] %v271_v17 }
 0x199   :  { %v273_v18 = vpop.f32.mrf.mxu2 }
 0x19a   :  { %v274_v20 = vadd.f32 %v273_v18, %v633_v44 }
 0x19c   :  { %322 = vst [vmem:[#allocation7 + $0x68] sm:$0xff] %v274_v20 }
 0x1a1   :  { %v276_v22 = vpop.f32.mrf.mxu2 }
 0x1a2   :  { %v277_v24 = vadd.f32 %v276_v22, %v633_v44 }
 0x1a4   :  { %323 = vst [vmem:[#allocation7 + $0x70] sm:$0xff] %v277_v24 }
 0x1a9   :  { %v279_v26 = vpop.f32.mrf.mxu2 }
 0x1aa   :  { %v280_v28 = vadd.f32 %v279_v26, %v633_v44 }
 0x1ac   :  { %324 = vst [vmem:[#allocation7 + $0x78] sm:$0xff] %v280_v28 }
 0x1b1   :  { %v282_v30 = vpop.f32.mrf.mxu2 }
 0x1b2   :  { %v283_v32 = vadd.f32 %v282_v30, %v633_v44 }
 0x1b4   :  { %325 = vst [vmem:[#allocation7 + $0x80] sm:$0xff] %v283_v32 }
 0x1b9   :  { %v285_v34 = vpop.f32.mrf.mxu2 }
 0x1ba   :  { %v286_v35 = vadd.f32 %v285_v34, %v633_v44 }
 0x1bc   :  { %326 = vst [vmem:[#allocation7 + $0x88] sm:$0xff] %v286_v35 }
 0x1c1   :  { %v288_v36 = vpop.f32.mrf.mxu2 }
 0x1c2   :  { %v289_v37 = vadd.f32 %v288_v36, %v633_v44 }
 0x1c4   :  { %327 = vst [vmem:[#allocation7 + $0x90] sm:$0xff] %v289_v37 }
 0x1c9   :  { %v291_v38 = vpop.f32.mrf.mxu2 }
 0x1ca   :  { %v292_v39 = vadd.f32 %v291_v38, %v633_v44 }
 0x1cc   :  { %328 = vst [vmem:[#allocation7 + $0x98] sm:$0xff] %v292_v39 }
 0x1d1   :  { %v294_v40 = vpop.f32.mrf.mxu2 }
 0x1d2   :  { %v295_v42 = vadd.f32 %v294_v40, %v633_v44 }
 0x1d4   :  { %329 = vst [vmem:[#allocation7 + $0xa0] sm:$0xff] %v295_v42 }
 0x1d5   :  { %346 = dma.vmem_to_hbm [thread:$0]  %s339_s28, 3200, %s341_s5, [#allocation4], %s487_s23, %s487_s23, %s488_s24  }
 0x1d6   :  { %484 = dma.done.wait [#allocation4], 3200  }
 0x1d7   :  { %485 = vsyncadd [#allocation4], 4294964096 }
 0x1d8   :  { %351 = vsyncpa [#allocation3], 1 }
 0x1d9   :  { %352 = vsyncpa [#allocation6], 1 }
 0x1da   :  { %353 = vsyncpa [#allocation4], 1 }

</bundles_post_ra>
